<compile_context>
chip_gen: v7x
topology: tpu7x:2x2x1
jax: 0.10.0
libtpu: 0.0.40
codegen_flags: <defaults>
</compile_context>

<pallas_src>
import functools
import math

import jax
import jax.numpy as jnp
from jax.experimental import pallas as pl
from jax.experimental.pallas import tpu as pltpu


# ---------------------------------------------------------------------------
# Tiling configuration
# ---------------------------------------------------------------------------
_TM, _TN, _TK = 512, 512, 512          # tile targets
_NI_MAX = 4                            # max instances per grid step (fallback path)
_VMEM_LIMIT = 48 * 1024 * 1024         # safe on v5e/v6e (128 MiB) and v7x (64 MiB/TC)
_BLOCK_DIAG_MAX_ELEMS = 4 * 1024 * 1024  # n*d_in * n*d_out threshold for no-transpose path


def _cdiv(a, b):
    return -(-a // b)


def _round_up(v, m):
    return _cdiv(v, m) * m


def _dim_and_tile(dim, target, align):
    """Return (padded_dim, tile, n_blocks).

    dim <= target -> single full-extent block (always legal, no padding).
    dim >  target -> balanced tiles aligned to `align` (8 for sublane dims,
    128 for lane dims), instead of rounding up to a full `target` multiple.
    """
    if dim <= target:
        return dim, dim, 1
    nb = _cdiv(dim, target)
    tile = _round_up(_cdiv(dim, nb), align)
    return tile * nb, tile, nb


# ---------------------------------------------------------------------------
# Kernels
# ---------------------------------------------------------------------------
def _single_k_kernel(x_ref, w_ref, o_ref, *, compute_dtype):
    # x_ref: (ni, tm, K), w_ref: (ni, K, tn), o_ref: (ni, tm, tn)
    # Whole contraction in one step: no accumulator scratch at all.
    x = x_ref[...]
    w = w_ref[...]
    if compute_dtype is not None:
        # In-kernel cast (VPU) -> MXU runs at bf16 peak; f32 accumulation.
        x = x.astype(compute_dtype)
        w = w.astype(compute_dtype)
    o_ref[...] = jnp.einsum(
        "imk,iko->imo", x, w, preferred_element_type=jnp.float32
    ).astype(o_ref.dtype)


def _multi_k_kernel(x_ref, w_ref, o_ref, acc_ref, *, compute_dtype):
    # Grid: (instance_block, M_tile, N_tile, K_tile); K innermost.
    k = pl.program_id(3)
    x = x_ref[...]
    w = w_ref[...]
    if compute_dtype is not None:
        x = x.astype(compute_dtype)
        w = w.astype(compute_dtype)
    p = jnp.einsum("imk,iko->imo", x, w, preferred_element_type=jnp.float32)

    @pl.when(k == 0)
    def _first():
        acc_ref[...] = p           # first-iteration assign: no zero-init pass

    @pl.when(k > 0)
    def _accum():
        acc_ref[...] += p

    @pl.when(k == pl.num_programs(3) - 1)
    def _done():
        o_ref[...] = acc_ref[...].astype(o_ref.dtype)


# ---------------------------------------------------------------------------
# Shared driver: x (n, M, K) @ w (n, K, N) -> (n, M, N)
# ---------------------------------------------------------------------------
def _tiled_linear(x_nmk, w_nkn, out_dtype, compute_dtype=None):
    n, M, K = x_nmk.shape
    n_w, K_w, N = w_nkn.shape
    assert (n, K) == (n_w, K_w)

    M_pad, tm, m_blocks = _dim_and_tile(M, _TM, 8)
    K_pad, tk, k_blocks = _dim_and_tile(K, _TK, 128)
    N_pad, tn, n_blocks = _dim_and_tile(N, _TN, 128)
    # Note: N <= _TN stays a full-extent lane block (e.g. d_out=16 -> 16 lanes,
    # masked vst) -- 8x less output HBM traffic than padding to 128 lanes.

    # Instances per grid step: largest divisor of n <= _NI_MAX amortizes the
    # ~0.35us fixed per-step overhead (only the transpose-fallback path has
    # n > 1 here).
    # TODO(synk): zero-pad n (pad W, slice outputs) so prime n > 4 still gets
    # ni == _NI_MAX instead of ni == 1.
    ni = max(d for d in range(1, min(n, _NI_MAX) + 1) if n % d == 0)
    inst_blocks = n // ni

    # v7x has 2 TensorCores: give the grid at least 2 parallel blocks when it
    # would otherwise collapse to a single block (no effect on v5e/v6e).
    if inst_blocks == 1 and m_blocks == 1 and n_blocks == 1 and M >= 16:
        tm = _round_up(_cdiv(M, 2), 8)
        M_pad, m_blocks = 2 * tm, 2

    # Zero padding (numerically safe: padded rows/cols contribute zeros).
    if (M_pad, K_pad) != (M, K):
        x_nmk = jnp.pad(x_nmk, ((0, 0), (0, M_pad - M), (0, K_pad - K)))
    if (K_pad, N_pad) != (K, N):
        w_nkn = jnp.pad(w_nkn, ((0, 0), (0, K_pad - K), (0, N_pad - N)))

    if k_blocks == 1:
        # Fast path: whole contraction in one step, no accumulator scratch.
        grid = (inst_blocks, m_blocks, n_blocks)
        kernel = functools.partial(_single_k_kernel, compute_dtype=compute_dtype)
        in_specs = [
            pl.BlockSpec((ni, tm, tk), lambda g, i, j: (g, i, 0)),
            # Weight index_map independent of the M-tile axis -> weight block
            # stays VMEM-resident across batch tiles.
            pl.BlockSpec((ni, tk, tn), lambda g, i, j: (g, 0, j)),
        ]
        out_spec = pl.BlockSpec((ni, tm, tn), lambda g, i, j: (g, i, j))
        scratch = []
        dims = ("parallel", "parallel", "parallel")
    else:
        grid = (inst_blocks, m_blocks, n_blocks, k_blocks)
        kernel = functools.partial(_multi_k_kernel, compute_dtype=compute_dtype)
        in_specs = [
            pl.BlockSpec((ni, tm, tk), lambda g, i, j, k: (g, i, k)),
            pl.BlockSpec((ni, tk, tn), lambda g, i, j, k: (g, k, j)),
        ]
        out_spec = pl.BlockSpec((ni, tm, tn), lambda g, i, j, k: (g, i, j))
        scratch = [pltpu.VMEM((ni, tm, tn), jnp.float32)]
        dims = ("parallel", "parallel", "parallel", "arbitrary")

    out = pl.pallas_call(
        kernel,
        out_shape=jax.ShapeDtypeStruct((n, M_pad, N_pad), out_dtype),
        grid_spec=pltpu.PrefetchScalarGridSpec(
            num_scalar_prefetch=0,
            grid=grid,
            in_specs=in_specs,
            out_specs=out_spec,
            scratch_shapes=scratch,
        ),
        compiler_params=pltpu.CompilerParams(
            dimension_semantics=dims,
            # Worst case double-buffered f32 usage at 512-class tiles with
            # ni=4 is ~28 MiB: under this 48 MiB budget on every generation
            # (v5e/v6e 128 MiB physical, v7x 64 MiB per TC).
            vmem_limit_bytes=_VMEM_LIMIT,
        ),
    )(x_nmk, w_nkn)

    if (M_pad, N_pad) != (M, N):
        out = out[:, :M, :N]
    return out


# ---------------------------------------------------------------------------
# Wrappers (PyTorch layout convention)
# ---------------------------------------------------------------------------
def linear_no_instance(x, w, compute_dtype=None):
    """x: (batch, ..., d_in), w: (d_in, d_out) -> (batch, ..., d_out)."""
    d_in, d_out = w.shape
    lead = x.shape[:-1]
    M = int(math.prod(lead)) if lead else 1
    x3 = x.reshape(M, d_in)[None]                    # (1, M, d_in): free reshape
    out = _tiled_linear(x3, w[None], x.dtype, compute_dtype)
    return out[0].reshape(*lead, d_out)


def linear_with_instances(x, w, compute_dtype=None):
    """x: (batch, ..., n_instances, d_in), w: (n, d_in, d_out)."""
    n, d_in, d_out = w.shape
    lead = x.shape[:-2]
    M = int(math.prod(lead)) if lead else 1

    if n * d_in * n * d_out <= _BLOCK_DIAG_MAX_ELEMS:
        # No-transpose path (SPD regime: small n/d_in/d_out): fold the
        # per-instance contraction into one matmul against a block-diagonal
        # weight. x and out are only reshaped (contiguous, free), so they
        # never take an extra HBM round trip. The tiny weight is expanded by
        # a factor n (negligible for small layers).
        eye = jnp.eye(n, dtype=w.dtype)
        w_bd = jnp.einsum("iko,ij->ikjo", w, eye).reshape(n * d_in, n * d_out)
        x3 = x.reshape(M, n * d_in)[None]            # (1, M, n*d_in)
        out = _tiled_linear(x3, w_bd[None], x.dtype, compute_dtype)
        return out[0].reshape(*lead, n, d_out)

    # Fallback for large per-instance layers: instance-major layout.
    # TODO(synk): this transpose costs one extra HBM read+write of x/out;
    # avoiding it needs a size-1 block on the (middle) instance axis which the
    # Pallas TPU block-shape rule does not allow.
    x3 = jnp.transpose(x.reshape(M, n, d_in), (1, 0, 2))     # (n, M, d_in)
    out = _tiled_linear(x3, w, x.dtype, compute_dtype)       # (n, M, d_out)
    return jnp.transpose(out, (1, 0, 2)).reshape(*lead, n, d_out)


# ---------------------------------------------------------------------------
# Deterministic parameter init (kaiming_uniform-like, init_scale=1.0)
# ---------------------------------------------------------------------------
def init_weight(key, shape, init_scale=1.0):
    d_in = shape[-2]
    bound = init_scale * math.sqrt(3.0) * math.sqrt(2.0) / math.sqrt(d_in)
    return jax.random.uniform(key, shape, jnp.float32, minval=-bound, maxval=bound)


# ---------------------------------------------------------------------------
# Main
# ---------------------------------------------------------------------------
if __name__ == "__main__":
    key = jax.random.PRNGKey(0)
    k_x1, k_w1, k_x2, k_w2, k_x4, k_w4 = jax.random.split(key, 6)
    HI = jax.lax.Precision.HIGHEST

    # ---- case 1: no n_instances, extra leading dims (single-K fast path) ---
    batch, seq, d_in, d_out = 2, 8, 32, 16
    x1 = jax.random.normal(k_x1, (batch, seq, d_in), jnp.float32)
    w1 = init_weight(k_w1, (d_in, d_out))
    out1 = jax.block_until_ready(linear_no_instance(x1, w1))
    ref1 = jnp.einsum("bsi,io->bso", x1, w1, precision=HI)
    assert out1.shape == (batch, seq, d_out)
    assert out1.dtype == x1.dtype
    assert jnp.allclose(out1, ref1, atol=1e-5, rtol=1e-5)

    # ---- case 2: with n_instances (block-diagonal no-transpose path) -------
    n_instances = 3
    x2 = jax.random.normal(k_x2, (batch, n_instances, d_in), jnp.float32)
    w2 = init_weight(k_w2, (n_instances, d_in, d_out))
    out2 = jax.block_until_ready(linear_with_instances(x2, w2))
    ref2 = jnp.einsum("bni,nio->bno", x2, w2, precision=HI)
    assert out2.shape == (batch, n_instances, d_out)
    assert jnp.allclose(out2, ref2, atol=1e-5, rtol=1e-5)

    # ---- case 3: bf16 compute path (in-kernel cast, f32 accumulation) ------
    out3 = jax.block_until_ready(
        linear_with_instances(x2, w2, compute_dtype=jnp.bfloat16)
    )
    assert out3.shape == (batch, n_instances, d_out)
    assert out3.dtype == jnp.float32
    assert jnp.allclose(out3, ref2, atol=5e-2, rtol=5e-2)

    # ---- case 4: larger K exercises the multi-K accumulator kernel ---------
    M4, K4, N4 = 32, 640, 256
    x4 = jax.random.normal(k_x4, (M4, K4), jnp.float32)
    w4 = init_weight(k_w4, (K4, N4))
    out4 = jax.block_until_ready(linear_no_instance(x4, w4))
    ref4 = jnp.einsum("mk,ko->mo", x4, w4, precision=HI)
    assert out4.shape == (M4, N4)
    assert jnp.allclose(out4, ref4, atol=1e-4, rtol=1e-4)

    print("KERNEL_OK")
</pallas_src>

<mosaic_0001>
module attributes {stable_mosaic.version = 11 : i64} {
  func.func @_single_k_kernel(%arg0: i32, %arg1: i32, %arg2: i32, %arg3: memref<1x8x32xf32, #tpu.memory_space<vmem>>, %arg4: memref<1x32x16xf32, #tpu.memory_space<vmem>>, %arg5: memref<1x8x16xf32, #tpu.memory_space<vmem>>) attributes {dimension_semantics = [#tpu.dimension_semantics<parallel>, #tpu.dimension_semantics<parallel>, #tpu.dimension_semantics<parallel>], iteration_bounds = array<i64: 1, 2, 1>, scalar_prefetch = 0 : i64, scratch_operands = 0 : i64, tpu.core_type = #tpu.core_type<tc>, window_params = [{transform_indices = @transform_0, window_bounds = array<i64: 1, 8, 32>}, {transform_indices = @transform_1, window_bounds = array<i64: 1, 32, 16>}, {transform_indices = @transform_2, window_bounds = array<i64: 1, 8, 16>}]} {
    %c0 = arith.constant 0 : index
    %c0_0 = arith.constant 0 : index
    %c0_1 = arith.constant 0 : index
    %0 = vector.load %arg3[%c0, %c0_0, %c0_1] : memref<1x8x32xf32, #tpu.memory_space<vmem>>, vector<1x8x32xf32>
    %c0_2 = arith.constant 0 : index
    %c0_3 = arith.constant 0 : index
    %c0_4 = arith.constant 0 : index
    %1 = vector.load %arg4[%c0_2, %c0_3, %c0_4] : memref<1x32x16xf32, #tpu.memory_space<vmem>>, vector<1x32x16xf32>
    "tpu.trace_start"() <{level = 10 : i32, message = "imk,iko->imo"}> : () -> ()
    %cst = arith.constant dense<0.000000e+00> : vector<1x8x16xf32>
    %2 = tpu.matmul %0, %1, %cst {dimension_numbers = #tpu.dot_dimension_numbers<[2], [1], [1], [2], [0, 0, 0, 1, 1, 2], [0], [0]>} : vector<1x8x32xf32>, vector<1x32x16xf32>, vector<1x8x16xf32> -> vector<1x8x16xf32>
    "tpu.trace_stop"() : () -> ()
    %c0_5 = arith.constant 0 : index
    %c0_6 = arith.constant 0 : index
    %c0_7 = arith.constant 0 : index
    %3 = vector.load %arg5[%c0_5, %c0_6, %c0_7] : memref<1x8x16xf32, #tpu.memory_space<vmem>>, vector<1x8x16xf32>
    tpu.vector_store %arg5[%c0_5, %c0_6, %c0_7], %2 {strides = array<i32>} : memref<1x8x16xf32, #tpu.memory_space<vmem>>, vector<1x8x16xf32>,
    return
  }
  func.func @transform_0(%arg0: i32, %arg1: i32, %arg2: i32) -> (i32, i32, i32) {
    %c0_i32 = arith.constant 0 : i32
    %c0_i32_0 = arith.constant 0 : i32
    return %arg0, %arg1, %c0_i32 : i32, i32, i32
  }
  func.func @transform_1(%arg0: i32, %arg1: i32, %arg2: i32) -> (i32, i32, i32) {
    %c0_i32 = arith.constant 0 : i32
    %c0_i32_0 = arith.constant 0 : i32
    return %arg0, %c0_i32, %arg2 : i32, i32, i32
  }
  func.func @transform_2(%arg0: i32, %arg1: i32, %arg2: i32) -> (i32, i32, i32) {
    %c0_i32 = arith.constant 0 : i32
    return %arg0, %arg1, %arg2 : i32, i32, i32
  }
}

</mosaic_0001>

<bundles_post_ra>
// kernel: tpu_custom_call.1
= control target key start
LH: loop header
LB: loop body
LE: loop exit
PB: predicated region body
PF: predicated region fallthrough
CT: control target
= control target key end

     0   :  { %7 = vsyncpa [#allocation3], 0  ;;  %s721_s0 = inlined_call_operand.vmem [shape: f32[1,16,32], index: 0, kind: input, shape index: {}]   ;;  %s722_s1 = inlined_call_operand.vmem [shape: f32[1,32,16], index: 1, kind: input, shape index: {}]   ;;  %s723_s2 = inlined_call_operand.hbm [shape: f32[1,16,16], index: 2, kind: output, shape index: {}]  }
   0x1   :  { %9 = vsyncpa [#allocation3 + $0x1], 0  ;;  %s597_s9 = smov 0   ;;  %s599_s10 = smov 0  }
   0x2   :  { %s601_s11 = smov 0   ;;  %s603_s12 = smov 0  }
   0x3   :  { %s605_s13 = smov 0   ;;  %s607_s14 = smov 0  }
   0x4 LB: > { %s405_s15 = sadd.s32 4294967295, %s576_s14   ;;  %s406_s16 = sadd.s32 4294967294, %s576_s14   ;;  %s576_s14 = sphi %s607_s14, %s15_s14   ;;  %s572_s13 = sphi %s605_s13, %s730_s13   ;;  %s568_s12 = sphi %s603_s12, %s729_s12   ;;  %s564_s11 = sphi %s601_s11, %s728_s11   ;;  %s560_s10 = sphi %s599_s10, %s727_s10   ;;  %s556_s9 = sphi %s597_s9, %s726_s9  }
   0x5   : > { %s30_s17 = sadd.s32 1, %s572_s13  ;;  %s101_s18 = sadd.s32 1, %s564_s11 }
   0x6   : > { %p32_p0 = scmp.ge.s32.totalorder %s30_s17, 2  ;;  %p111_p1 = scmp.ne.s32.totalorder %s564_s11, %s560_s10 }
   0x7   : > { %p112_p2 = scmp.eq.s32.totalorder %s405_s15, 1  ;;  %p117_p3 = scmp.ne.s32.totalorder %s560_s10, %s556_s9 }
   0x8   : > { %s732_s17 = smov (%p32_p0, %s30_s17), 0  ;;  %p118_p5 = scmp.eq.s32.totalorder %s406_s16, 1 }
   0x9   : > { %p637_p4 = por %p112_p2, %p111_p1  ;;  %s95_s20 = ssub.s32 %s572_s13, %s732_s17 }
   0xa   : > { %p410_p6 = scmp.ge.s32.totalorder %s576_s14, 1  ;;  %p99_p7 = scmp.eq.s32.totalorder %s95_s20, 0 }
   0xb   : > { %p644_p8 = por %p118_p5, %p117_p3  ;;  %p158_p9 = scmp.lt.s32.totalorder %s576_s14, 3 }
   0xc   : > { %s650_s22 = scalar_select %p99_p7, %s564_s11, %s101_s18  }
   0xd   : > { %p159_p10 = pnand %p410_p6, %p158_p9 }
   0xe   : > { %v208_v0 = vld [vmem:[%s722_s1] sm:$0xff] (!%p159_p10)  ;;  %v209_v1 = vld [vmem:[%s722_s1 + $0x8] sm:$0xff] (!%p159_p10)  ;;  %v210_v2 = vld [vmem:[%s722_s1 + $0x10] sm:$0xff] (!%p159_p10)  ;;  %v578_v3 = vmov (!%p159_p10), 0.0|0.0   ;;  %vm579_vm0 = vmmov (!%p159_p10), 0   ;;  %v580_v6 = vmov (!%p159_p10), 0.0  }
   0xf   : > { %162 = sbr.rel (%p159_p10) target bundleno = 253 (0xfd), region = 28  ;;  %434 = vmatprep.subr.bf16.mxu0 (!%p159_p10), %v578_v3  ;;  %v435_v4 = vpack.c.bf16 (!%p159_p10), %v209_v1, %v208_v0  ;;  %v211_v5 = vld [vmem:[%s722_s1 + $0x18] sm:$0xff] (!%p159_p10)  ;;  %431 = vmatprep.mubr.msk.f32.mxu0 (!%p159_p10), %vm579_vm0, %v580_v6  ;;  %p193_p11 = scmp.lt.s32.totalorder (!%p159_p10), %s568_s12, 1  ;;  %vm212_vm1 = vcmask (!%p159_p10), 261120   ;;  %vm286_vm2 = vcmask (!%p159_p10), 130048  }
  0x10   : > { %v438_v7 = vpack.c.bf16 (!%p159_p10), %v211_v5, %v210_v2  ;;  %s188_s8 = sand.u32 (!%p159_p10), 1, %s560_s10   ;;  %s415_s16 = sshll.u32 (!%p159_p10), %s568_s12, 7 }
  0x11   : > { %436 = vmatpush3.bf16.msra.mxu0 (!%p159_p10), %v435_v4  ;;  %s411_s15 = sshll.u32 (!%p159_p10), %s188_s8, 3  ;;  %s674_s25 = scalar_lea.hbm (!%p159_p10), %s723_s2, %s415_s16 }
  0x12   : > { %437 = vmatprep.subr.bf16.mxu0 (!%p159_p10), %v578_v3  ;;  %s190_s18 = scalar_lea.vmem (!%p159_p10), [#allocation2], %s411_s15  ;;  %s289_s26 = scalar_lea.sflag (!%p159_p10), [#allocation3], %s188_s8 }
  0x13   : > { %s305_s20 = sshll.u32 (!%p159_p10), %s190_s18, 4  ;;  %s676_s20 = int_to_ptr.vmem [resolvable:$true] %s305_s20 }
  0x14   : > { %s498_s27 = scalar_lea.vmem (!%p159_p10), %s676_s20, 128 }
  0x15   : > { %439 = vmatpush3.bf16.msra.mxu0 (!%p159_p10), %v438_v7  ;;  %p499_p12 = scmp.ne.s32.totalorder (!%p159_p10), %s676_s20, %s498_s27 }
  0x16   : > { %s194_s3 = scalar_select %p193_p11, %s568_s12, 1 }
  0x17   : > { %p500_p13 = pnand %p499_p12, %p637_p4  ;;  %s581_s12 = smov [#allocation2]  }
  0x18   : > { %s412_s4 = sshll.u32 %s194_s3, 3  ;;  %s502_s28 = sshll.u32 %s581_s12, 4  ;;  %s503_s28 = int_to_ptr.vmem [resolvable:$false] %s502_s28 }
  0x19   : > { %s198_s7 = scalar_lea.vmem %s721_s0, %s412_s4  ;;  %p501_p0 = pneg %p500_p13 }
  0x1a   : > { %v207_v8 = vld [vmem:[%s198_s7] sm:$0xff]  ;;  %s504_s29 = scalar_lea.vmem %s503_s28, 256  ;;  %p505_p1 = scmp.lt.s32.totalorder %s676_s20, %s503_s28 }
  0x1b   : > { %432 = vmatmul.mubr.msk.f32.vlgmr.msra.gmra.mrb[0].mxu0 %vm212_vm1, %v207_v8  ;;  %p506_p2 = scmp.lt.s32.totalorder %s504_s29, %s498_s27 }
  0x1d   : > { %p507_p3 = por %p506_p2, %p505_p1 }
  0x1f   : > { %p508_p5 = pnand %p507_p3, %p501_p0 }
  0xee   : > { %v282_v9 = vpop.f32.mrb[0].mxu0 }
  0xef   : > { %287 = vst.msk [vmem:[%s190_s18] sm:$0xff] %vm286_vm2, %v282_v9  ;;  %v433_v10 = vpop.f32.mrb[1].mxu0 }
  0xf0   : > { %511 = shalt.err (!%p508_p5)
}
  0xf1   : > { %s512_s30 = scalar_lea.hbm %s674_s25, 128  ;;  %s516_s5 = scalar_lea.hbm %s723_s2, 256 }
  0xf2   : > { %p513_p6 = scmp.ne.s32.totalorder %s674_s25, %s512_s30  ;;  %p517_p10 = scmp.lt.u32.totalorder %s674_s25, %s723_s2 }
  0xf3   : > { %p518_p11 = scmp.lt.u32.totalorder %s516_s5, %s512_s30  ;;  %p520_p13 = scmp.lt.u32.totalorder %s512_s30, %s674_s25 }
  0xf4   : > { %p514_p7 = pnand %p513_p6, %p637_p4 }
  0xf5   : > { %p519_p12 = por %p518_p11, %p517_p10 }
  0xf6   : > { %p515_p9 = pneg %p514_p7 }
  0xf7   : > { %p521_p0 = por %p520_p13, %p519_p12 }
  0xf9   : > { %p522_p1 = pnand %p521_p0, %p515_p9 }
  0xfb   : > { %525 = shalt.err (!%p522_p1)
}
  0xfc   : > { %440 = dma.vmem_to_hbm [thread:$0]  (%p637_p4), %s676_s20, 128, %s674_s25, %s289_s26  }
  0xfd PF: > { %p446_p2 = scmp.ge.s32.totalorder %s576_s14, 2  ;;  %s317_s8 = sand.u32 1, %s556_s9  }
  0xfe   : > { %s318_s15 = scalar_lea.sflag [#allocation3], %s317_s8 }
  0xff   : > { %p443_p3 = pnand %p446_p2, %p644_p8 }
 0x101   : > { %551 = dma.done.wait (!%p443_p3), %s318_s15, 128  }
 0x102   : > { %553 = vsyncadd (!%p443_p3), %s318_s15, 4294967168  ;;  %s15_s14 = sadd.s32 1, %s576_s14   ;;  %s726_s9 = smov %s560_s10 }
 0x103   : > { %p12_p5 = scmp.ge.s32.totalorder %s15_s14, 4   ;;  %s727_s10 = smov %s564_s11 }
 0x104   : > { %s728_s11 = smov %s650_s22  ;;  %s729_s12 = smov %s572_s13 }
 0x105   : > { %s730_s13 = smov %s732_s17  ;;  %14 = sbr.rel (!%p12_p5) target bundleno = 4 (0x4), region = 66 }
 0x10c   :  { %323 = vsyncpa [#allocation3], 1 }
 0x10d   :  { %325 = vsyncpa [#allocation3 + $0x1], 1 }

</bundles_post_ra>
